<compile_context>
chip_gen: v7x
topology: tpu7x:2x2x1
jax: 0.10.0
libtpu: 0.0.40
codegen_flags: <defaults>
</compile_context>

<pallas_src>
import jax
import jax.numpy as jnp
from jax.experimental import pallas as pl
from jax.experimental.pallas import tpu as pltpu

# --- neuron constants (match module __init__ defaults) ---
A = 0.02
B = 0.2
D = 8.0
V_THRESHOLD = -5.0
V_RESET = -6.5            # == c
MU0 = B * V_RESET         # initial recovery variable

# Constant-folded charge step: with v0, mu0 scalar constants,
#   v1 = v0 + (0.4*v0^2 + 5*v0 + 14 - mu0 + x) = x + V1_OFFSET
V1_OFFSET = V_RESET + (0.4 * V_RESET * V_RESET + 5.0 * V_RESET + 14.0 - MU0)


def _izk_spike_kernel(x_ref, spike_ref):
    """Spike-only path: the module forward() returns only the spike tensor."""
    x = x_ref[...].astype(jnp.float32)
    v1 = x + jnp.float32(V1_OFFSET)
    spike = (v1 >= jnp.float32(V_THRESHOLD)).astype(spike_ref.dtype)
    spike_ref[...] = spike


def _izk_full_kernel(x_ref, spike_ref, v_ref, mu_ref):
    """Optional path that also writes the updated (v, mu) state back to HBM."""
    x = x_ref[...].astype(jnp.float32)
    v1 = x + jnp.float32(V1_OFFSET)                                  # neuronal_charge
    mu1 = jnp.float32(MU0) + jnp.float32(A) * (jnp.float32(B) * v1 - jnp.float32(MU0))
    spike_b = v1 >= jnp.float32(V_THRESHOLD)                         # neuronal_fire
    v2 = jnp.where(spike_b, jnp.float32(V_RESET), v1)                # neuronal_reset
    mu2 = mu1 + jnp.float32(D / 10.0)

    spike_ref[...] = spike_b.astype(spike_ref.dtype)
    v_ref[...] = v2.astype(v_ref.dtype)
    mu_ref[...] = mu2.astype(mu_ref.dtype)


def _plan_tiling(n_elems: int):
    """Pick a lane-dense slab shape and block size for n_elems f32 elements."""
    lanes = 1024                       # wide, lane-dense last dim (multiple of 128)
    chunk = lanes * 8                  # keep rows a multiple of 8 (sublane tiling)
    n_pad = ((n_elems + chunk - 1) // chunk) * chunk
    rows = n_pad // lanes

    block_rows = min(512, rows)        # 512 x 1024 f32 = 2 MiB per operand tile
    if rows >= 32:
        # give the megacore (v7x: 2 TCs) at least ~4 grid steps to shard
        block_rows = min(block_rows, max(8, (rows // 4) // 8 * 8))
    block_rows = max(8, (block_rows // 8) * 8)

    grid = (pl.cdiv(rows, block_rows),)
    return lanes, n_pad, rows, block_rows, grid


def izk_neuron_forward(x: jax.Array, return_state: bool = False):
    """One IZK forward step.

    Returns spike (same shape/dtype as x); if return_state, also (v_new, mu_new).
    """
    orig_shape = x.shape
    orig_dtype = x.dtype
    n = x.size

    lanes, n_pad, rows, block_rows, grid = _plan_tiling(n)

    xf = x.reshape(-1)
    if n_pad != n:
        xf = jnp.pad(xf, (0, n_pad - n))
    x2d = xf.reshape(rows, lanes)

    spec = pl.BlockSpec((block_rows, lanes), lambda i: (i, 0))
    out_sds = jax.ShapeDtypeStruct((rows, lanes), orig_dtype)
    compiler_params = pltpu.CompilerParams(
        dimension_semantics=("parallel",),
        vmem_limit_bytes=32 * 1024 * 1024,
    )

    def _unpad(a):
        return a.reshape(-1)[:n].reshape(orig_shape)

    if return_state:
        spike2d, v2d, mu2d = pl.pallas_call(
            _izk_full_kernel,
            out_shape=(out_sds, out_sds, out_sds),
            grid_spec=pltpu.PrefetchScalarGridSpec(
                num_scalar_prefetch=0,
                grid=grid,
                in_specs=[spec],
                out_specs=[spec, spec, spec],
            ),
            compiler_params=compiler_params,
        )(x2d)
        return _unpad(spike2d), _unpad(v2d), _unpad(mu2d)

    spike2d = pl.pallas_call(
        _izk_spike_kernel,
        out_shape=out_sds,
        grid_spec=pltpu.PrefetchScalarGridSpec(
            num_scalar_prefetch=0,
            grid=grid,
            in_specs=[spec],
            out_specs=spec,
        ),
        compiler_params=compiler_params,
    )(x2d)
    return _unpad(spike2d)


def _izk_reference(x):
    """Pure-JAX reference mirroring the PyTorch forward literally."""
    x = x.astype(jnp.float32)
    v = jnp.full_like(x, V_RESET)
    mu = jnp.full_like(x, MU0)
    v = v + (0.4 * v * v + 5.0 * v + 14.0 - mu + x)
    mu = mu + A * (B * v - mu)
    spike = (v - V_THRESHOLD >= 0.0).astype(jnp.float32)
    v = (1.0 - spike) * v + spike * V_RESET
    mu = mu + D / 10.0
    return spike, v, mu


if __name__ == "__main__":
    key = jax.random.PRNGKey(0)
    # NCHW input, as the PyTorch module would receive
    x = jax.random.normal(key, (2, 4, 16, 16), dtype=jnp.float32) * 5.0

    # fast path: spike only (matches forward() return value)
    spike = izk_neuron_forward(x)
    jax.block_until_ready(spike)

    # full-state path (optional), validated too
    spike_s, v_new, mu_new = izk_neuron_forward(x, return_state=True)
    jax.block_until_ready(spike_s)

    spike_ref, v_ref, mu_ref = _izk_reference(x)
    assert spike.shape == x.shape and spike.dtype == x.dtype
    assert jnp.allclose(spike, spike_ref)
    assert jnp.allclose(spike_s, spike_ref)
    assert jnp.allclose(v_new, v_ref, atol=1e-5)
    assert jnp.allclose(mu_new, mu_ref, atol=1e-5)

    print("KERNEL_OK")
</pallas_src>

<mosaic_0001>
module attributes {stable_mosaic.version = 11 : i64} {
  func.func @_izk_spike_kernel(%arg0: i32, %arg1: memref<8x1024xf32, #tpu.memory_space<vmem>>, %arg2: memref<8x1024xf32, #tpu.memory_space<vmem>>) attributes {dimension_semantics = [#tpu.dimension_semantics<parallel>], iteration_bounds = array<i64: 1>, scalar_prefetch = 0 : i64, scratch_operands = 0 : i64, tpu.core_type = #tpu.core_type<tc>, window_params = [{transform_indices = @transform_0, window_bounds = array<i64: 8, 1024>}, {transform_indices = @transform_1, window_bounds = array<i64: 8, 1024>}]} {
    %c0 = arith.constant 0 : index
    %c0_0 = arith.constant 0 : index
    %0 = vector.load %arg1[%c0, %c0_0] : memref<8x1024xf32, #tpu.memory_space<vmem>>, vector<8x1024xf32>
    %cst = arith.constant -6.800000e+00 : f32
    %1 = vector.broadcast %cst : f32 to vector<8x1024xf32>
    %2 = arith.addf %0, %1 : vector<8x1024xf32>
    %cst_1 = arith.constant -5.000000e+00 : f32
    %3 = vector.broadcast %cst_1 : f32 to vector<8x1024xf32>
    %4 = arith.cmpf oge, %2, %3 : vector<8x1024xf32>
    %5 = arith.extui %4 : vector<8x1024xi1> to vector<8x1024xi32>
    %6 = arith.sitofp %5 : vector<8x1024xi32> to vector<8x1024xf32>
    %c0_2 = arith.constant 0 : index
    %c0_3 = arith.constant 0 : index
    %7 = vector.load %arg2[%c0_2, %c0_3] : memref<8x1024xf32, #tpu.memory_space<vmem>>, vector<8x1024xf32>
    tpu.vector_store %arg2[%c0_2, %c0_3], %6 {strides = array<i32>} : memref<8x1024xf32, #tpu.memory_space<vmem>>, vector<8x1024xf32>,
    return
  }
  func.func @transform_0(%arg0: i32) -> (i32, i32) {
    %c0_i32 = arith.constant 0 : i32
    %c0_i32_0 = arith.constant 0 : i32
    return %arg0, %c0_i32 : i32, i32
  }
  func.func @transform_1(%arg0: i32) -> (i32, i32) {
    %c0_i32 = arith.constant 0 : i32
    %c0_i32_0 = arith.constant 0 : i32
    return %arg0, %c0_i32 : i32, i32
  }
}

</mosaic_0001>

<bundles_post_ra>
// kernel: tpu_custom_call.1
= control target key start
LH: loop header
LB: loop body
LE: loop exit
PB: predicated region body
PF: predicated region fallthrough
CT: control target
= control target key end

     0   :  { %6 = vsyncpa [#allocation3], 0  ;;  %s180_s0 = inlined_call_operand.hbm [shape: f32[8,1024], index: 0, kind: input, shape index: {}]   ;;  %s181_s1 = inlined_call_operand.hbm [shape: f32[8,1024], index: 1, kind: output, shape index: {}]  }
   0x1   :  { %7 = vsyncpa [#allocation4], 0  ;;  %s143_s6 = smov [#allocation2]   ;;  %s95_s10 = scalar_lea.hbm %s180_s0, 1024 }
   0x2   :  { %s14_s7 = sshll.u32 %s143_s6, 4  ;;  %p96_p0 = scmp.ne.s32.totalorder %s180_s0, %s95_s10  ;;  %s15_s7 = int_to_ptr.vmem [resolvable:$true] %s14_s7 }
   0x3   :  { %p99_p1 = scmp.lt.u32.totalorder %s95_s10, %s180_s0 }
   0x5   :  { %p101_p2 = pnand %p99_p1, %p96_p0 }
   0x7   :  { %104 = shalt.err (!%p101_p2)
}
   0x8   :  { %s105_s15 = scalar_lea.vmem %s15_s7, 1024  ;;  %p110_p4 = scmp.lt.s32.totalorder %s15_s7, %s15_s7 }
   0x9   :  { %p106_p3 = scmp.ne.s32.totalorder %s15_s7, %s105_s15  ;;  %p111_p5 = scmp.lt.s32.totalorder %s105_s15, %s105_s15 }
   0xb   :  { %p112_p6 = por %p111_p5, %p110_p4 }
   0xd   :  { %p113_p7 = pnand %p112_p6, %p106_p3 }
   0xf   :  { %116 = shalt.err (!%p113_p7)
}
  0x10   :  { %17 = dma.hbm_to_vmem [thread:$0]  %s180_s0, 1024, %s15_s7, [#allocation3]  }
  0x11   :  { %139 = dma.done.wait [#allocation3], 1024  }
  0x12   :  { %140 = vsyncadd [#allocation3], 4294966272  ;;  %v21_v0 = vld [vmem:[#allocation2] sm:$0xff]  ;;  %v22_v1 = vld [vmem:[#allocation2 + $0x8] sm:$0xff]  ;;  %v144_v11 = vmov 0.0   ;;  %s145_s0 = smov [#allocation5]  }
  0x13   :  { %v23_v2 = vld [vmem:[#allocation2 + $0x10] sm:$0xff]  ;;  %v29_v3 = vadd.f32 -6.8, %v21_v0  ;;  %v30_v4 = vadd.f32 -6.8, %v22_v1  ;;  %v24_v6 = vld [vmem:[#allocation2 + $0x18] sm:$0xff] }
  0x14   :  { %v31_v5 = vadd.f32 -6.8, %v23_v2  ;;  %v25_v7 = vld [vmem:[#allocation2 + $0x20] sm:$0xff]  ;;  %v26_v8 = vld [vmem:[#allocation2 + $0x28] sm:$0xff]  ;;  %v32_v9 = vadd.f32 -6.8, %v24_v6 }
  0x15   :  { %vm37_vm0 = vcmp.ge.f32.partialorder %v29_v3, -5.0  ;;  %vm38_vm1 = vcmp.ge.f32.partialorder %v30_v4, -5.0  ;;  %v27_v10 = vld [vmem:[#allocation2 + $0x30] sm:$0xff]  ;;  %v33_v15 = vadd.f32 -6.8, %v25_v7  ;;  %v28_v16 = vld [vmem:[#allocation2 + $0x38] sm:$0xff] }
  0x16   :  { %vm39_vm2 = vcmp.ge.f32.partialorder %v31_v5, -5.0  ;;  %v84_v12 = vsel %vm37_vm0, 1.0, %v144_v11  ;;  %v85_v13 = vsel %vm38_vm1, 1.0, %v144_v11  ;;  %vm40_vm3 = vcmp.ge.f32.partialorder %v32_v9, -5.0  ;;  %s75_s18 = sshll.u32 %s145_s0, 4  ;;  %s76_s18 = int_to_ptr.vmem [resolvable:$true] %s75_s18 }
  0x17   :  { %v86_v14 = vsel %vm39_vm2, 1.0, %v144_v11  ;;  %61 = vst [vmem:[#allocation5] sm:$0xff] %v84_v12  ;;  %62 = vst [vmem:[#allocation5 + $0x8] sm:$0xff] %v85_v13  ;;  %v34_v17 = vadd.f32 -6.8, %v26_v8  ;;  %v87_v19 = vsel %vm40_vm3, 1.0, %v144_v11  ;;  %p122_p9 = scmp.lt.s32.totalorder %s76_s18, %s76_s18 }
  0x18   :  { %63 = vst [vmem:[#allocation5 + $0x10] sm:$0xff] %v86_v14  ;;  %v35_v18 = vadd.f32 -6.8, %v27_v10  ;;  %vm41_vm4 = vcmp.ge.f32.partialorder %v33_v15, -5.0  ;;  %v36_v20 = vadd.f32 -6.8, %v28_v16 }
  0x19   :  { %64 = vst [vmem:[#allocation5 + $0x18] sm:$0xff] %v87_v19  ;;  %v88_v21 = vsel %vm41_vm4, 1.0, %v144_v11  ;;  %vm42_vm5 = vcmp.ge.f32.partialorder %v34_v17, -5.0  ;;  %s117_s19 = scalar_lea.vmem %s76_s18, 1024 }
  0x1a   :  { %vm43_vm6 = vcmp.ge.f32.partialorder %v35_v18, -5.0  ;;  %65 = vst [vmem:[#allocation5 + $0x20] sm:$0xff] %v88_v21  ;;  %v89_v22 = vsel %vm42_vm5, 1.0, %v144_v11  ;;  %vm44_vm7 = vcmp.ge.f32.partialorder %v36_v20, -5.0  ;;  %p118_p8 = scmp.ne.s32.totalorder %s76_s18, %s117_s19  ;;  %p123_p10 = scmp.lt.s32.totalorder %s117_s19, %s117_s19 }
  0x1b   :  { %v90_v23 = vsel %vm43_vm6, 1.0, %v144_v11  ;;  %66 = vst [vmem:[#allocation5 + $0x28] sm:$0xff] %v89_v22  ;;  %v91_v24 = vsel %vm44_vm7, 1.0, %v144_v11 }
  0x1c   :  { %67 = vst [vmem:[#allocation5 + $0x30] sm:$0xff] %v90_v23  ;;  %68 = vst [vmem:[#allocation5 + $0x38] sm:$0xff] %v91_v24  ;;  %p124_p11 = por %p123_p10, %p122_p9 }
  0x1e   :  { %p125_p12 = pnand %p124_p11, %p118_p8 }
  0x20   :  { %128 = shalt.err (!%p125_p12)
}
  0x21   :  { %s129_s22 = scalar_lea.hbm %s181_s1, 1024 }
  0x22   :  { %p130_p13 = scmp.ne.s32.totalorder %s181_s1, %s129_s22  ;;  %p133_p0 = scmp.lt.u32.totalorder %s129_s22, %s181_s1 }
  0x24   :  { %p135_p1 = pnand %p133_p0, %p130_p13 }
  0x26   :  { %138 = shalt.err (!%p135_p1)
}
  0x27   :  { %78 = dma.vmem_to_hbm [thread:$0]  %s76_s18, 1024, %s181_s1, [#allocation4]  }
  0x28   :  { %141 = dma.done.wait [#allocation4], 1024  }
  0x29   :  { %142 = vsyncadd [#allocation4], 4294966272 }
  0x2a   :  { %82 = vsyncpa [#allocation3], 1 }
  0x2b   :  { %83 = vsyncpa [#allocation4], 1 }

</bundles_post_ra>
